<compile_context>
chip_gen: v7x
topology: tpu7x:2x2x1
jax: 0.10.0
libtpu: 0.0.40
codegen_flags: <defaults>
</compile_context>

<pallas_src>
import numpy as np
import jax
import jax.numpy as jnp
from jax.experimental import pallas as pl
from jax.experimental.pallas import tpu as pltpu


def mpnn4_kernel(sizes_ref,                                    # SMEM (n_graphs,) int32
                 a_ref,                                        # (1, row_tile, G) bf16
                 xw_ref,                                       # (1, G, H)        bf16
                 b1_ref, wl1_ref, bl1_ref, wl2_ref, bl2_ref,   # f32 consts
                 out_ref,                                      # (1, 1, 1)        f32
                 u_acc_ref):                                   # scratch (1, H)   f32
    g = pl.program_id(0)          # graph axis ("parallel")
    r = pl.program_id(1)          # row-tile axis within a graph ("arbitrary")
    row_tile = a_ref.shape[1]

    @pl.when(r == 0)
    def _init():
        u_acc_ref[...] = jnp.zeros_like(u_acc_ref)

    # --- GCNConv on this row tile of graph g: h = relu(A_g[tile] @ (X W1)_g + b1)
    h = jnp.dot(a_ref[0], xw_ref[0], preferred_element_type=jnp.float32)
    h = jnp.maximum(h + b1_ref[...], 0.0)                      # (row_tile, H) f32

    # --- global_add_pool: mask rows beyond this graph's node count, f32 row-sum
    #     via a tiny (1, row_tile) x (row_tile, H) matmul (MXU, negligible cost).
    n_g = sizes_ref[g]
    row_ids = jax.lax.broadcasted_iota(jnp.int32, (1, row_tile), 1) + r * row_tile
    mask = (row_ids < n_g).astype(jnp.float32)
    u_acc_ref[...] += jnp.dot(mask, h, preferred_element_type=jnp.float32)

    # --- per-graph MLP head on the last row tile of this graph
    @pl.when(r == pl.num_programs(1) - 1)
    def _head():
        u = u_acc_ref[...]                                     # (1, H) f32
        o1 = jnp.dot(u, wl1_ref[...], preferred_element_type=jnp.float32)
        o1 = jnp.maximum(o1 + bl1_ref[...], 0.0)               # (1, 16)
        o2 = jnp.dot(o1, wl2_ref[...], preferred_element_type=jnp.float32)
        out_ref[...] = (o2 + bl2_ref[...]).reshape(out_ref.shape)


def _round_up(n, m):
    return -(-n // m) * m


def _pick_row_tile(G, hidden, vmem_limit_bytes):
    """Largest row tile (multiple of 8 dividing G) whose double-buffered A block
    fits the VMEM budget after charging the other resident/double-buffered blocks."""
    lane = lambda n: _round_up(n, 128)
    sub = lambda n: _round_up(n, 8)
    xw_bytes = 2 * sub(G) * lane(hidden) * 2        # bf16 XW block, double-buffered
    const_bytes = 2 * 5 * 8 * 128 * 4               # 5 tiny f32 const blocks (padded bound)
    scratch_bytes = 8 * lane(hidden) * 4            # pooled-feature accumulator
    slack = 4 << 20
    per_buf = max(
        (vmem_limit_bytes - xw_bytes - const_bytes - scratch_bytes - slack) // 2,
        1 << 19)
    row_tile = 8
    for t in range(8, G + 1, 8):
        if G % t == 0 and t * lane(G) * 2 <= per_buf:
            row_tile = t
    return row_tile


def mpnn4_forward(x, edge_index, graph_sizes, w1, b1, wl1, bl1, wl2, bl2,
                  *, row_tile=None, vmem_limit_bytes=None):
    """MPNN4 forward pass.

    graph_sizes: Python sequence of per-graph node counts (contiguous PyG batching,
    no cross-graph edges). Returns a (n_graphs,) array, matching `out.view(-1)`.
    """
    graph_sizes = [int(s) for s in graph_sizes]
    n_graphs = len(graph_sizes)
    n_nodes, n_feat = x.shape
    hidden = w1.shape[1]
    assert sum(graph_sizes) == n_nodes

    # Generation-aware VMEM budget (v7x: 64 MiB physical; v5e/v6e: 128 MiB).
    if vmem_limit_bytes is None:
        try:
            cap = int(pltpu.get_tpu_info().vmem_capacity_bytes)
        except Exception:
            cap = 64 * 1024 * 1024                   # v7x-conservative fallback
        vmem_limit_bytes = cap * 3 // 4              # 48 MiB on v7x, 96 MiB on v5e/v6e

    G = _round_up(max(graph_sizes), 8)               # padded per-graph node count
    if row_tile is None:
        row_tile = _pick_row_tile(G, hidden, vmem_limit_bytes)
    assert G % row_tile == 0 and row_tile % 8 == 0

    # --- static batching structure (numpy) -------------------------------------
    starts_np = np.concatenate([[0], np.cumsum(graph_sizes)[:-1]]).astype(np.int32)
    batch_np = np.repeat(np.arange(n_graphs, dtype=np.int32), graph_sizes)
    local_np = np.arange(n_nodes, dtype=np.int32) - starts_np[batch_np]
    batch = jnp.asarray(batch_np)
    local = jnp.asarray(local_np)
    sizes = jnp.asarray(graph_sizes, dtype=jnp.int32)

    # --- block-diagonal GCN-normalized adjacency, packed per graph: (B, G, G) ---
    src, dst = edge_index
    adj = jnp.zeros((n_graphs, G, G), jnp.float32)
    adj = adj.at[batch[dst], local[dst], local[src]].add(1.0)   # messages j -> i
    adj = adj.at[batch, local, local].add(1.0)                  # self-loops
    deg = adj.sum(axis=2)
    dinv = jnp.where(deg > 0, 1.0 / jnp.sqrt(jnp.maximum(deg, 1e-12)), 0.0)
    a_packed = (dinv[:, :, None] * adj * dinv[:, None, :]).astype(jnp.bfloat16)

    # --- X @ W1 hoisted out of the kernel, packed per graph: (B, G, H) ----------
    xw = x.astype(jnp.float32) @ w1.astype(jnp.float32)
    xw_packed = jnp.zeros((n_graphs, G, hidden), jnp.float32)
    xw_packed = xw_packed.at[batch, local, :].set(xw).astype(jnp.bfloat16)

    b1_f = b1.astype(jnp.float32).reshape(1, hidden)
    wl1_f = wl1.astype(jnp.float32).reshape(hidden, 16)
    bl1_f = bl1.astype(jnp.float32).reshape(1, 16)
    wl2_f = wl2.astype(jnp.float32).reshape(16, 1)
    bl2_f = bl2.astype(jnp.float32).reshape(1, 1)

    grid = (n_graphs, G // row_tile)
    const = lambda shape: pl.BlockSpec(shape, lambda g, r, sz: tuple(0 for _ in shape))

    out = pl.pallas_call(
        mpnn4_kernel,
        out_shape=jax.ShapeDtypeStruct((n_graphs, 1, 1), jnp.float32),
        grid_spec=pltpu.PrefetchScalarGridSpec(
            num_scalar_prefetch=1,                   # per-graph node counts -> SMEM
            grid=grid,
            in_specs=[
                pl.BlockSpec((1, row_tile, G), lambda g, r, sz: (g, r, 0)),  # A_g rows
                pl.BlockSpec((1, G, hidden),   lambda g, r, sz: (g, 0, 0)),  # (X W1)_g
                const((1, hidden)),                                          # GCN bias
                const((hidden, 16)),                                         # lin1 W
                const((1, 16)),                                              # lin1 b
                const((16, 1)),                                              # lin2 W
                const((1, 1)),                                               # lin2 b
            ],
            out_specs=pl.BlockSpec((1, 1, 1), lambda g, r, sz: (g, 0, 0)),
            scratch_shapes=[pltpu.VMEM((1, hidden), jnp.float32)],           # pooled u
        ),
        compiler_params=pltpu.CompilerParams(
            # graph axis is independent (megacore-shardable on v7x);
            # row-tile axis carries the pooled reduction.
            dimension_semantics=("parallel", "arbitrary"),
            vmem_limit_bytes=vmem_limit_bytes,
        ),
    )(sizes, a_packed, xw_packed, b1_f, wl1_f, bl1_f, wl2_f, bl2_f)
    return out.reshape(-1)   # matches `out.view(-1)`


if __name__ == "__main__":
    # Small synthetic workload with variable graph sizes (exercises padding/masking):
    # 8 graphs, 192 nodes total, 8 node features, hidden_size = 32.
    n_node_features = 8
    hidden_size = 32
    graph_sizes = [24, 32, 17, 40, 9, 30, 28, 12]
    n_graphs = len(graph_sizes)
    n_nodes = sum(graph_sizes)

    key = jax.random.PRNGKey(0)
    k_x, k_w1, k_b1, k_wl1, k_bl1, k_wl2, k_bl2 = jax.random.split(key, 7)

    x = jax.random.normal(k_x, (n_nodes, n_node_features), jnp.float32)

    # Deterministic edges: bidirectional ring inside each graph (no cross-graph edges)
    src_list, dst_list = [], []
    base = 0
    for sz in graph_sizes:
        for i in range(sz):
            a, b = base + i, base + (i + 1) % sz
            src_list += [a, b]
            dst_list += [b, a]
        base += sz
    edge_index = jnp.array([src_list, dst_list], dtype=jnp.int32)

    # Parameters (deterministic, PyTorch-like uniform fan-in init)
    def uinit(k, shape, fan_in):
        bound = 1.0 / float(np.sqrt(fan_in))
        return jax.random.uniform(k, shape, jnp.float32, -bound, bound)

    w1 = uinit(k_w1, (n_node_features, hidden_size), n_node_features)   # GCNConv weight
    b1 = uinit(k_b1, (1, hidden_size), n_node_features)                 # GCNConv bias
    wl1 = uinit(k_wl1, (hidden_size, 16), hidden_size)                  # lin1 weight
    bl1 = uinit(k_bl1, (1, 16), hidden_size)                            # lin1 bias
    wl2 = uinit(k_wl2, (16, 1), 16)                                     # lin2 weight
    bl2 = uinit(k_bl2, (1, 1), 16)                                      # lin2 bias

    # row_tile=8 forces several pipelined row tiles per graph (exercises the
    # init / accumulate / per-graph-head paths); leave row_tile=None to
    # auto-pick the biggest VMEM-safe tile in production.
    out = mpnn4_forward(x, edge_index, graph_sizes, w1, b1, wl1, bl1, wl2, bl2,
                        row_tile=8)
    jax.block_until_ready(out)

    # Pure f32 JAX reference (dense A_hat + one-hot pool); tolerance accounts for
    # the bf16 A / XW streams (accumulation is f32).
    src, dst = edge_index
    adj = jnp.zeros((n_nodes, n_nodes), jnp.float32).at[dst, src].add(1.0)
    adj = adj + jnp.eye(n_nodes, dtype=jnp.float32)
    deg = adj.sum(axis=1)
    dinv = jnp.where(deg > 0, 1.0 / jnp.sqrt(deg), 0.0)
    a_hat = dinv[:, None] * adj * dinv[None, :]
    batch = jnp.asarray(np.repeat(np.arange(n_graphs), graph_sizes), jnp.int32)
    pool = (batch[None, :] == jnp.arange(n_graphs)[:, None]).astype(jnp.float32)
    h_ref = jax.nn.relu(a_hat @ (x @ w1) + b1)
    u_ref = pool @ h_ref
    ref = (jax.nn.relu(u_ref @ wl1 + bl1) @ wl2 + bl2).reshape(-1)

    assert out.shape == (n_graphs,)
    assert jnp.allclose(out, ref, atol=5e-2, rtol=5e-2), (out, ref)

    print("KERNEL_OK")
</pallas_src>

<mosaic_0001>
module attributes {stable_mosaic.version = 11 : i64} {
  func.func @mpnn4_kernel(%arg0: i32, %arg1: i32, %arg2: memref<8xi32, #tpu.memory_space<smem>>, %arg3: memref<1x8x40xbf16, #tpu.memory_space<vmem>>, %arg4: memref<1x40x32xbf16, #tpu.memory_space<vmem>>, %arg5: memref<1x32xf32, #tpu.memory_space<vmem>>, %arg6: memref<32x16xf32, #tpu.memory_space<vmem>>, %arg7: memref<1x16xf32, #tpu.memory_space<vmem>>, %arg8: memref<16x1xf32, #tpu.memory_space<vmem>>, %arg9: memref<1x1xf32, #tpu.memory_space<vmem>>, %arg10: memref<1x1x1xf32, #tpu.memory_space<vmem>>, %arg11: memref<1x32xf32, #tpu.memory_space<vmem>>) attributes {dimension_semantics = [#tpu.dimension_semantics<parallel>, #tpu.dimension_semantics<arbitrary>], iteration_bounds = array<i64: 8, 5>, scalar_prefetch = 1 : i64, scratch_operands = 1 : i64, tpu.core_type = #tpu.core_type<tc>, window_params = [{transform_indices = @transform_0, window_bounds = array<i64: 1, 8, 40>}, {transform_indices = @transform_1, window_bounds = array<i64: 1, 40, 32>}, {pipeline_mode = #tpu.pipeline_mode<synchronous>, transform_indices = @transform_2, window_bounds = array<i64: 1, 32>}, {pipeline_mode = #tpu.pipeline_mode<synchronous>, transform_indices = @transform_3, window_bounds = array<i64: 32, 16>}, {pipeline_mode = #tpu.pipeline_mode<synchronous>, transform_indices = @transform_4, window_bounds = array<i64: 1, 16>}, {pipeline_mode = #tpu.pipeline_mode<synchronous>, transform_indices = @transform_5, window_bounds = array<i64: 16, 1>}, {pipeline_mode = #tpu.pipeline_mode<synchronous>, transform_indices = @transform_6, window_bounds = array<i64: 1, 1>}, {transform_indices = @transform_7, window_bounds = array<i64: 1, 1, 1>}]} {
    %c0_i32 = arith.constant 0 : i32
    %0 = arith.cmpi eq, %arg1, %c0_i32 : i32
    %1 = arith.extui %0 : i1 to i32
    %c0_i32_0 = arith.constant 0 : i32
    %2 = arith.cmpi ne, %1, %c0_i32_0 : i32
    scf.if %2 {
      %cst_15 = arith.constant 0.000000e+00 : f32
      %30 = vector.broadcast %cst_15 : f32 to vector<1x32xf32>
      %c0_16 = arith.constant 0 : index
      %c0_17 = arith.constant 0 : index
      %31 = vector.load %arg11[%c0_16, %c0_17] : memref<1x32xf32, #tpu.memory_space<vmem>>, vector<1x32xf32>
      tpu.vector_store %arg11[%c0_16, %c0_17], %30 {strides = array<i32>} : memref<1x32xf32, #tpu.memory_space<vmem>>, vector<1x32xf32>,
    } else {
    }
    %c0 = arith.constant 0 : index
    %c0_1 = arith.constant 0 : index
    %c0_2 = arith.constant 0 : index
    %3 = vector.load %arg3[%c0, %c0_1, %c0_2] : memref<1x8x40xbf16, #tpu.memory_space<vmem>>, vector<1x8x40xbf16>
    %4 = vector.shape_cast %3 : vector<1x8x40xbf16> to vector<8x40xbf16>
    %c0_3 = arith.constant 0 : index
    %c0_4 = arith.constant 0 : index
    %c0_5 = arith.constant 0 : index
    %5 = vector.load %arg4[%c0_3, %c0_4, %c0_5] : memref<1x40x32xbf16, #tpu.memory_space<vmem>>, vector<1x40x32xbf16>
    %6 = vector.shape_cast %5 : vector<1x40x32xbf16> to vector<40x32xbf16>
    %cst = arith.constant dense<0.000000e+00> : vector<8x32xf32>
    %7 = tpu.matmul %4, %6, %cst {dimension_numbers = #tpu.dot_dimension_numbers<[1], [0], [0], [1], [0, 0, 1, 1], [], []>} : vector<8x40xbf16>, vector<40x32xbf16>, vector<8x32xf32> -> vector<8x32xf32>
    %c0_6 = arith.constant 0 : index
    %c0_7 = arith.constant 0 : index
    %8 = vector.load %arg5[%c0_6, %c0_7] : memref<1x32xf32, #tpu.memory_space<vmem>>, vector<1x32xf32>
    %9 = vector.broadcast %8 : vector<1x32xf32> to vector<8x32xf32>
    %10 = arith.addf %7, %9 : vector<8x32xf32>
    %cst_8 = arith.constant 0.000000e+00 : f32
    %11 = vector.broadcast %cst_8 : f32 to vector<8x32xf32>
    %12 = arith.maximumf %10, %11 : vector<8x32xf32>
    %13 = arith.index_cast %arg0 : i32 to index
    %14 = memref.load %arg2[%13] : memref<8xi32, #tpu.memory_space<smem>>
    %15 = tpu.iota {dimensions = array<i32: 1>} : vector<1x8xi32>
    %c8_i32 = arith.constant 8 : i32
    %16 = arith.muli %arg1, %c8_i32 : i32
    %17 = vector.broadcast %16 : i32 to vector<1x8xi32>
    %18 = arith.addi %15, %17 : vector<1x8xi32>
    %19 = vector.broadcast %14 : i32 to vector<1x8xi32>
    %20 = arith.cmpi slt, %18, %19 : vector<1x8xi32>
    %21 = arith.extui %20 : vector<1x8xi1> to vector<1x8xi32>
    %22 = arith.sitofp %21 : vector<1x8xi32> to vector<1x8xf32>
    %c0_9 = arith.constant 0 : index
    %c0_10 = arith.constant 0 : index
    %23 = vector.load %arg11[%c0_9, %c0_10] : memref<1x32xf32, #tpu.memory_space<vmem>>, vector<1x32xf32>
    %cst_11 = arith.constant dense<0.000000e+00> : vector<1x32xf32>
    %24 = tpu.matmul %22, %12, %cst_11 {dimension_numbers = #tpu.dot_dimension_numbers<[1], [0], [0], [1], [0, 0, 1, 1], [], []>} : vector<1x8xf32>, vector<8x32xf32>, vector<1x32xf32> -> vector<1x32xf32>
    %25 = arith.addf %23, %24 : vector<1x32xf32>
    %c0_12 = arith.constant 0 : index
    %c0_13 = arith.constant 0 : index
    %26 = vector.load %arg11[%c0_12, %c0_13] : memref<1x32xf32, #tpu.memory_space<vmem>>, vector<1x32xf32>
    tpu.vector_store %arg11[%c0_12, %c0_13], %25 {strides = array<i32>} : memref<1x32xf32, #tpu.memory_space<vmem>>, vector<1x32xf32>,
    %c4_i32 = arith.constant 4 : i32
    %27 = arith.cmpi eq, %arg1, %c4_i32 : i32
    %28 = arith.extui %27 : i1 to i32
    %c0_i32_14 = arith.constant 0 : i32
    %29 = arith.cmpi ne, %28, %c0_i32_14 : i32
    scf.if %29 {
      %c0_15 = arith.constant 0 : index
      %c0_16 = arith.constant 0 : index
      %30 = vector.load %arg11[%c0_15, %c0_16] : memref<1x32xf32, #tpu.memory_space<vmem>>, vector<1x32xf32>
      %c0_17 = arith.constant 0 : index
      %c0_18 = arith.constant 0 : index
      %31 = vector.load %arg6[%c0_17, %c0_18] : memref<32x16xf32, #tpu.memory_space<vmem>>, vector<32x16xf32>
      %cst_19 = arith.constant dense<0.000000e+00> : vector<1x16xf32>
      %32 = tpu.matmul %30, %31, %cst_19 {dimension_numbers = #tpu.dot_dimension_numbers<[1], [0], [0], [1], [0, 0, 1, 1], [], []>} : vector<1x32xf32>, vector<32x16xf32>, vector<1x16xf32> -> vector<1x16xf32>
      %c0_20 = arith.constant 0 : index
      %c0_21 = arith.constant 0 : index
      %33 = vector.load %arg7[%c0_20, %c0_21] : memref<1x16xf32, #tpu.memory_space<vmem>>, vector<1x16xf32>
      %34 = arith.addf %32, %33 : vector<1x16xf32>
      %cst_22 = arith.constant 0.000000e+00 : f32
      %35 = vector.broadcast %cst_22 : f32 to vector<1x16xf32>
      %36 = arith.maximumf %34, %35 : vector<1x16xf32>
      %c0_23 = arith.constant 0 : index
      %c0_24 = arith.constant 0 : index
      %37 = vector.load %arg8[%c0_23, %c0_24] : memref<16x1xf32, #tpu.memory_space<vmem>>, vector<16x1xf32>
      %cst_25 = arith.constant dense<0.000000e+00> : vector<1x1xf32>
      %38 = tpu.matmul %36, %37, %cst_25 {dimension_numbers = #tpu.dot_dimension_numbers<[1], [0], [0], [1], [0, 0, 1, 1], [], []>} : vector<1x16xf32>, vector<16x1xf32>, vector<1x1xf32> -> vector<1x1xf32>
      %c0_26 = arith.constant 0 : index
      %c0_27 = arith.constant 0 : index
      %39 = vector.load %arg9[%c0_26, %c0_27] : memref<1x1xf32, #tpu.memory_space<vmem>>, vector<1x1xf32>
      %40 = arith.addf %38, %39 : vector<1x1xf32>
      %41 = vector.shape_cast %40 : vector<1x1xf32> to vector<1x1x1xf32>
      %c0_28 = arith.constant 0 : index
      %c0_29 = arith.constant 0 : index
      %c0_30 = arith.constant 0 : index
      %42 = vector.load %arg10[%c0_28, %c0_29, %c0_30] : memref<1x1x1xf32, #tpu.memory_space<vmem>>, vector<1x1x1xf32>
      tpu.vector_store %arg10[%c0_28, %c0_29, %c0_30], %41 {strides = array<i32>} : memref<1x1x1xf32, #tpu.memory_space<vmem>>, vector<1x1x1xf32>,
    } else {
    }
    return
  }
  func.func @transform_0(%arg0: i32, %arg1: i32, %arg2: memref<8xi32, #tpu.memory_space<smem>>) -> (i32, i32, i32) {
    %c0_i32 = arith.constant 0 : i32
    %c0_i32_0 = arith.constant 0 : i32
    return %arg0, %arg1, %c0_i32 : i32, i32, i32
  }
  func.func @transform_1(%arg0: i32, %arg1: i32, %arg2: memref<8xi32, #tpu.memory_space<smem>>) -> (i32, i32, i32) {
    %c0_i32 = arith.constant 0 : i32
    %c0_i32_0 = arith.constant 0 : i32
    %c0_i32_1 = arith.constant 0 : i32
    return %arg0, %c0_i32, %c0_i32_0 : i32, i32, i32
  }
  func.func @transform_2(%arg0: i32, %arg1: i32, %arg2: memref<8xi32, #tpu.memory_space<smem>>) -> (i32, i32) {
    %c0_i32 = arith.constant 0 : i32
    %c0_i32_0 = arith.constant 0 : i32
    %c0_i32_1 = arith.constant 0 : i32
    return %c0_i32, %c0_i32_0 : i32, i32
  }
  func.func @transform_3(%arg0: i32, %arg1: i32, %arg2: memref<8xi32, #tpu.memory_space<smem>>) -> (i32, i32) {
    %c0_i32 = arith.constant 0 : i32
    %c0_i32_0 = arith.constant 0 : i32
    %c0_i32_1 = arith.constant 0 : i32
    return %c0_i32, %c0_i32_0 : i32, i32
  }
  func.func @transform_4(%arg0: i32, %arg1: i32, %arg2: memref<8xi32, #tpu.memory_space<smem>>) -> (i32, i32) {
    %c0_i32 = arith.constant 0 : i32
    %c0_i32_0 = arith.constant 0 : i32
    %c0_i32_1 = arith.constant 0 : i32
    return %c0_i32, %c0_i32_0 : i32, i32
  }
  func.func @transform_5(%arg0: i32, %arg1: i32, %arg2: memref<8xi32, #tpu.memory_space<smem>>) -> (i32, i32) {
    %c0_i32 = arith.constant 0 : i32
    %c0_i32_0 = arith.constant 0 : i32
    %c0_i32_1 = arith.constant 0 : i32
    return %c0_i32, %c0_i32_0 : i32, i32
  }
  func.func @transform_6(%arg0: i32, %arg1: i32, %arg2: memref<8xi32, #tpu.memory_space<smem>>) -> (i32, i32) {
    %c0_i32 = arith.constant 0 : i32
    %c0_i32_0 = arith.constant 0 : i32
    %c0_i32_1 = arith.constant 0 : i32
    return %c0_i32, %c0_i32_0 : i32, i32
  }
  func.func @transform_7(%arg0: i32, %arg1: i32, %arg2: memref<8xi32, #tpu.memory_space<smem>>) -> (i32, i32, i32) {
    %c0_i32 = arith.constant 0 : i32
    %c0_i32_0 = arith.constant 0 : i32
    %c0_i32_1 = arith.constant 0 : i32
    return %arg0, %c0_i32, %c0_i32_0 : i32, i32, i32
  }
}

</mosaic_0001>

<bundles_post_ra>
// kernel: tpu_custom_call.1
= control target key start
LH: loop header
LB: loop body
LE: loop exit
PB: predicated region body
PF: predicated region fallthrough
CT: control target
= control target key end

     0   :  { %s1080_s0 = inlined_call_operand.vmem [shape: s32[8], index: 0, kind: input, shape index: {}]   ;;  %s1081_s1 = inlined_call_operand.vmem [shape: bf16[8,40,40], index: 1, kind: input, shape index: {}]   ;;  %s1082_s2 = inlined_call_operand.vmem [shape: bf16[8,40,32], index: 2, kind: input, shape index: {}]   ;;  %s1083_s3 = inlined_call_operand.vmem [shape: f32[1,32], index: 3, kind: input, shape index: {}]   ;;  %s1084_s4 = inlined_call_operand.vmem [shape: f32[32,16], index: 4, kind: input, shape index: {}]   ;;  %s1085_s5 = inlined_call_operand.vmem [shape: f32[1,16], index: 5, kind: input, shape index: {}]   ;;  %s1086_s6 = inlined_call_operand.vmem [shape: f32[16,1], index: 6, kind: input, shape index: {}]   ;;  %s1087_s8 = inlined_call_operand.vmem [shape: f32[8,1,1], index: 8, kind: output, shape index: {}]   ;;  %s1088_s7 = inlined_call_operand.<no memory space> [shape: f32[1,1], index: 7, kind: input, shape index: {}]  }
   0x1   :  { %s13_s29 = sshll.u32 %s1080_s0, 4  ;;  %v17_v0 = vstv %s1088_s7  ;;  %s14_s29 = int_to_ptr.vmem [resolvable:$true] %s13_s29 }
   0x2   :  { %18 = vst [vmem:[#allocation5] sm:$0x1] %v17_v0  ;;  %s868_s10 = scalar_lea.vmem %s14_s29, 16  ;;  %p873_p1 = scmp.lt.s32.totalorder %s14_s29, %s14_s29 }
   0x3   :  { %p869_p0 = scmp.ne.s32.totalorder %s14_s29, %s868_s10  ;;  %p874_p2 = scmp.lt.s32.totalorder %s868_s10, %s868_s10 }
   0x5   :  { %p875_p3 = por %p874_p2, %p873_p1 }
   0x7   :  { %p876_p4 = pnand %p875_p3, %p869_p0 }
   0x9   :  { %879 = shalt.err (!%p876_p4)  }
   0xa   :  { %s922_s11 = smov [#allocation4]  }
   0xb   :  { %16 = dma.vmem_to_smem %s14_s29, 16, %s922_s11, [#allocation3] }
   0xc   :  { %900 = dma.done.wait [#allocation3], 16 }
   0xd   :  { %901 = vsyncadd [#allocation3], 4294967280 }
   0xe   :  { %20 = sfence }
   0xf   :  { %s980_s12 = smov 0   ;;  %s982_s0 = smov 0  }
  0x10   :  { %s984_s13 = smov 0   ;;  %s986_s7 = smov 0  }
  0x11   :  { %s988_s14 = smov 0  }
  0x12 LB: > { %s35_s15 = sadd.s32 1, %s912_s13  ;;  %s38_s16 = sadd.s32 1, %s916_s7  ;;  %s920_s14 = sphi %s988_s14, %s26_s14   ;;  %s916_s7 = sphi %s986_s7, %s1092_s7   ;;  %s912_s13 = sphi %s984_s13, %s1091_s13   ;;  %s908_s0 = sphi %s982_s0, %s1090_s0   ;;  %s904_s12 = sphi %s980_s12, %s1089_s12  }
  0x13   : > { %p36_p5 = scmp.ge.s32.totalorder %s35_s15, 5  ;;  %p743_p6 = scmp.ge.s32.totalorder %s920_s14, 1 }
  0x14   : > { %p273_p7 = scmp.lt.s32.totalorder %s920_s14, 41 }
  0x15   : > { %s1094_s15 = smov (%p36_p5, %s35_s15), 0  ;;  %s1096_s16 = smov (!%p36_p5, %s38_s16), %s916_s7 }
  0x16   : > { %p274_p8 = pnand %p743_p6, %p273_p7  ;;  %p40_p9 = scmp.ge.s32.totalorder %s1096_s16, 8 }
  0x17   : > { %p311_p10 = scmp.lt.s32.totalorder (!%p274_p8), %s908_s0, 7  ;;  %p313_p11 = scmp.lt.s32.totalorder (!%p274_p8), %s904_s12, 4 }
  0x18   : > { %s1098_s16 = smov (%p40_p9, %s1096_s16), 0  ;;  %277 = sbr.rel (%p274_p8) target bundleno = 925 (0x39d), region = 48 }
  0x19   : > { %p746_p12 = scmp.ne.s32.totalorder (!%p274_p8), %s904_s12, 0 }
  0x1f   : > { %s1017_s17 = scalar_select %p311_p10, %s908_s0, 7 }
  0x20   : > { %s314_s18 = scalar_select %p313_p11, %s904_s12, 4 }
  0x21   : > { %s816_s19 = smul.u32 5, %s1017_s17  ;;  %s326_s22 = scalar_lea.vmem %s1087_s8, %s1017_s17  ;;  %vm332_vm0 = vcmask (!%p746_p12), 253952   ;;  %v923_v1 = vmov (!%p746_p12), 0.0  }
  0x22   : > { %s817_s23 = smul.u32 20, %s1017_s17  ;;  %333 = vst.msk [vmem:[#allocation2] sm:$0x1] (!%p746_p12), %vm332_vm0, %v923_v1 }
  0x23   : > { %s316_s24 = sadd.s32 %s816_s19, %s314_s18  ;;  %331 = sbr.rel (%p746_p12) target bundleno = 42 (0x2a), region = 52 }
  0x24   : > { %s744_s25 = sshll.u32 %s316_s24, 2  ;;  %s323_s28 = scalar_lea.vmem %s1082_s2, %s817_s23 }
  0x25   : > { %s318_s9 = scalar_lea.vmem %s1081_s1, %s744_s25 }
  0x2a PF: > { %v865_v2 = vld [vmem:[%s323_s28] sm:$0xff]   ;;  %v924_v3 = vmov 0.0   ;;  %v866_v4 = vld [vmem:[%s323_s28 + $0x8] sm:$0xff]   ;;  %v867_v5 = vld [vmem:[%s323_s28 + $0x10] ss:$0 sps:$4 sm:$0xff]   ;;  %vm925_vm1 = vmmov 0   ;;  %v412_v8 = vlaneseq }
  0x2b   : > { %774 = vmatprep.subr.bf16.mxu0 %v924_v3  ;;  %784 = vmatprep.subr.mxu1 %v924_v3  ;;  %vm366_vm2 = vcmask 1043456   ;;  %v334_v7 = vld [vmem:[%s318_s9] sm:$0xf]  ;;  %vm362_vm3 = vcmask 326656   ;;  %s411_s10 = sld [smem:[#allocation4 + %s908_s0]]  ;;  %s752_s11 = sshll.u32 %s904_s12, 3 }
  0x2c   : > { %775 = vmatpush3.bf16.msra.mxu0 %v865_v2  ;;  %780 = vmatprep.mubr.msk.bf16.mxu0 %vm925_vm1, %v924_v3  ;;  %v368_v6 = vsel %vm366_vm2, %v867_v5, 0  ;;  %v413_v9 = vand.u32 127, %v412_v8  ;;  %v415_v10 = vstv %s752_s11  ;;  %v747_v13 = vld [vmem:[%s1083_s3] ss:$0 sm:$0xff]  ;;  %vm422_vm5 = vcmask 64512   ;;  %p755_p13 = scmp.ne.s32.totalorder %s904_s12, 4 }
  0x2d   : > { %776 = vmatprep.subr.bf16.mxu0 %v924_v3  ;;  %786 = vmatprep.mubr.msk.f32.mxu1 %vm925_vm1, %v924_v3  ;;  %v421_v21 = vld [vmem:[#allocation2] sm:$0x1]  ;;  %vm497_vm6 = vcmask 253952   ;;  %v505_v26 = vld [vmem:[%s1084_s4 + $0x8] sm:$0xff] (!%p755_p13)  ;;  %v506_v27 = vld [vmem:[%s1084_s4 + $0x10] sm:$0xff] (!%p755_p13)  ;;  %v926_v28 = vmov (!%p755_p13), 0.0|0.0  }
  0x2e   : > { %v416_v11 = vadd.s32 %v415_v10, %v413_v9  ;;  %v504_v25 = vld [vmem:[%s1084_s4] sm:$0xff] (!%p755_p13)  ;;  %v507_v30 = vld [vmem:[%s1084_s4 + $0x18] sm:$0xff] (!%p755_p13)  ;;  %vm927_vm7 = vmmov (!%p755_p13), 0   ;;  %v928_v31 = vmov (!%p755_p13), 0.0   ;;  %vm509_vm8 = vcmask (!%p755_p13), 261120   ;;  %v585_v35 = vld [vmem:[%s1086_s6 + $0x8] sm:$0xff] (!%p755_p13) }
  0x2f   : > { %v808_v29 = vpack.c.bf16 (!%p755_p13), %v505_v26, %v504_v25  ;;  %v811_v32 = vpack.c.bf16 (!%p755_p13), %v507_v30, %v506_v27  ;;  %v584_v34 = vld [vmem:[%s1086_s6] sm:$0xff] (!%p755_p13)  ;;  %vm587_vm9 = vcmask (!%p755_p13), 130048   ;;  %vm661_vm10 = vcmask (!%p755_p13), 0  }
  0x30   : > { %777 = vmatpush3.bf16.msra.mxu0 %v866_v4  ;;  %v814_v36 = vpack.c.bf16 (!%p755_p13), %v585_v35, %v584_v34  ;;  %v508_v37 = vld [vmem:[%s1085_s5] sm:$0x1] (!%p755_p13)  ;;  %v586_v42 = vld [vmem:[#allocation5] sm:$0x1] (!%p755_p13) }
  0x31   : > { %778 = vmatprep.subr.bf16.mxu0 %v924_v3  ;;  %v417_v12 = vstv %s411_s10 }
  0x32   : > { %vm418_vm4 = vcmp.lt.s32.totalorder %v416_v11, %v417_v12 }
  0x33   : > { %v753_v20 = vsel %vm418_vm4, 1.0, %v924_v3 }
  0x34   : > { %779 = vmatpush3.bf16.msra.mxu0 %v368_v6 }
  0x35   : > { %807 = vmatprep.subr.bf16.mxu0 (!%p755_p13), %v926_v28 }
  0x37   : > { %781 = vmatmul.mubr.msk.bf16.vlgmr.msra.gmra.mrb[0].mxu0 %vm362_vm3, %v334_v7 }
  0x38   : > { %797 = vmatprep.mubr.msk.f32.mxu0 (!%p755_p13), %vm927_vm7, %v928_v31  ;;  %809 = vmatpush3.bf16.msra.mxu0 (!%p755_p13), %v808_v29 }
  0x39   : > { %810 = vmatprep.subr.bf16.mxu0 (!%p755_p13), %v926_v28 }
  0x3c   : > { %812 = vmatpush3.bf16.msra.mxu0 (!%p755_p13), %v811_v32 }
 0x10a   : > { %v404_v14 = vpop.f32.mrb[0].mxu0 }
 0x10b   : > { %v405_v15 = vadd.f32 %v747_v13, %v404_v14  ;;  %v782_v16 = vpop.f32.mrb[1].mxu0 }
 0x10c   : > { %v407_v17 = vpop.f32.mrb[2].mxu0 }
 0x10d   : > { %v410_v18 = vmax.f32 %v405_v15, 0.0  ;;  %v783_v19 = vpop.f32.mrb[3].mxu0 }
 0x10f   : > { %785 = vmatpush3.msra.mxu1 %v410_v18 }
 0x110   : > { %787 = vmatmul.mubr.msk.f32.vlgmr.msra.gmra.mrb[0].mxu1 %vm422_vm5, %v753_v20  ;;  %813 = vmatprep.subr.bf16.mxu1 (!%p755_p13), %v926_v28 }
 0x111   : > { %804 = vmatprep.mubr.msk.f32.mxu1 (!%p755_p13), %vm927_vm7, %v928_v31  ;;  %815 = vmatpush3.bf16.msra.mxu1 (!%p755_p13), %v814_v36 }
 0x1e0   : > { %502 = sbr.rel (%p755_p13) target bundleno = 925 (0x39d), region = 56 }
 0x1e3   : > { %v492_v22 = vpop.f32.mrb[0].mxu1 }
 0x1e4   : > { %v496_v23 = vadd.f32 %v492_v22, %v421_v21  ;;  %v788_v24 = vpop.f32.mrb[1].mxu1 }
 0x1e6   : > { %498 = vst.msk [vmem:[#allocation2] sm:$0x1] %vm497_vm6, %v496_v23 }
 0x1ed   : > { %v503_v33 = vld [vmem:[#allocation2] sm:$0x1] }
 0x1ee   : > { %798 = vmatmul.mubr.msk.f32.vlgmr.msra.gmra.mrb[0].mxu0 %vm509_vm8, %v503_v33 }
 0x2c1   : > { %v579_v38 = vpop.f32.mrb[0].mxu0 }
 0x2c2   : > { %v580_v39 = vadd.f32 %v579_v38, %v508_v37  ;;  %v799_v40 = vpop.f32.mrb[1].mxu0 }
 0x2c4   : > { %v583_v41 = vmax.f32 %v580_v39, 0.0 }
 0x2c6   : > { %805 = vmatmul.mubr.msk.f32.vlgmr.msra.gmra.mrb[0].mxu1 %vm587_vm9, %v583_v41 }
 0x399   : > { %v657_v43 = vpop.f32.mrb[0].mxu1 }
 0x39a   : > { %v658_v44 = vadd.f32 %v657_v43, %v586_v42  ;;  %v806_v45 = vpop.f32.mrb[1].mxu1 }
 0x39c   : > { %662 = vst.msk [vmem:[%s326_s22] sm:$0x1] %vm661_vm10, %v658_v44 }
 0x39d PF: > { %s26_s14 = sadd.s32 1, %s920_s14   ;;  %s1089_s12 = smov %s912_s13 }
 0x39e   : > { %p23_p0 = scmp.ge.s32.totalorder %s26_s14, 42   ;;  %s1090_s0 = smov %s916_s7 }
 0x39f   : > { %s1091_s13 = smov %s1094_s15  ;;  %s1092_s7 = smov %s1098_s16 }
 0x3a0   :  { %25 = sbr.rel (!%p23_p0) target bundleno = 18 (0x12), region = 89 }

</bundles_post_ra>
